<compile_context>
chip_gen: v7x
topology: tpu7x:2x2x1
jax: 0.10.0
libtpu: 0.0.40
codegen_flags: <defaults>
</compile_context>

<pallas_src>
import functools

import jax
import jax.numpy as jnp
from jax.experimental import pallas as pl
from jax.experimental.pallas import tpu as pltpu

NEG_SLOPE = 0.01          # F.leaky_relu default negative_slope
FUSED_MAX_N_PAD = 1024    # A_hat (bf16) <= 2 MiB -> keep resident in VMEM, fuse layers


def _round_up(v, m):
    return ((v + m - 1) // m) * m


# ----------------------------------------------------------------------------
# Fused two-layer kernel (small graphs: everything resident in VMEM).
# ----------------------------------------------------------------------------
def fused_gcn_kernel(a_ref, x_ref, w1_ref, b1_ref, w2_ref, b2_ref, o_ref):
    a = a_ref[...]                                            # bf16 (N, N), read once
    # Layer 1: leaky_relu(A_hat @ (X @ W1) + b1); dropout (eval) = identity.
    xw1 = jnp.dot(x_ref[...], w1_ref[...],
                  preferred_element_type=jnp.float32)         # bf16 x bf16 -> f32
    h = jnp.dot(a, xw1.astype(jnp.bfloat16),
                preferred_element_type=jnp.float32) + b1_ref[...]
    h = jnp.where(h > 0, h, NEG_SLOPE * h)
    # Layer 2: A_hat @ (h @ W2) + b2
    hw2 = jnp.dot(h.astype(jnp.bfloat16), w2_ref[...],
                  preferred_element_type=jnp.float32)
    out = jnp.dot(a, hw2.astype(jnp.bfloat16),
                  preferred_element_type=jnp.float32) + b2_ref[...]
    o_ref[...] = out.astype(o_ref.dtype)


def _fused_forward(a_hat, x_p, w1_p, b1_p, w2_p, b2_p):
    n_pad = a_hat.shape[0]
    c_pad = x_p.shape[1]
    h_pad = w1_p.shape[1]
    o_pad = w2_p.shape[1]

    cost = pl.CostEstimate(
        flops=int(2 * n_pad * n_pad * (h_pad + o_pad)
                  + 2 * n_pad * c_pad * h_pad
                  + 2 * n_pad * h_pad * o_pad),
        transcendentals=0,
        bytes_accessed=int(n_pad * n_pad * 2
                           + n_pad * (c_pad * 2 + o_pad * 4)),
    )

    return pl.pallas_call(
        fused_gcn_kernel,
        out_shape=jax.ShapeDtypeStruct((n_pad, o_pad), jnp.float32),
        grid_spec=pltpu.PrefetchScalarGridSpec(
            num_scalar_prefetch=0,
            grid=(1,),
            in_specs=[
                pl.BlockSpec((n_pad, n_pad), lambda i: (0, 0)),   # A_hat (bf16)
                pl.BlockSpec((n_pad, c_pad), lambda i: (0, 0)),   # X (bf16)
                pl.BlockSpec((c_pad, h_pad), lambda i: (0, 0)),   # W1 (bf16)
                pl.BlockSpec((1, h_pad), lambda i: (0, 0)),       # b1 (f32)
                pl.BlockSpec((h_pad, o_pad), lambda i: (0, 0)),   # W2 (bf16)
                pl.BlockSpec((1, o_pad), lambda i: (0, 0)),       # b2 (f32)
            ],
            out_specs=pl.BlockSpec((n_pad, o_pad), lambda i: (0, 0)),
        ),
        compiler_params=pltpu.CompilerParams(
            dimension_semantics=("arbitrary",),
            vmem_limit_bytes=48 * 1024 * 1024,
        ),
        cost_estimate=cost,
    )(a_hat, x_p, w1_p, b1_p, w2_p, b2_p)


# ----------------------------------------------------------------------------
# Tiled fallback: one layer = A_hat @ XW + b  (XW hoisted, bf16 side-inputs).
# ----------------------------------------------------------------------------
def gcn_spmm_kernel(a_ref, xw_ref, b_ref, o_ref, acc_ref, *, apply_act):
    k = pl.program_id(1)

    @pl.when(k == 0)
    def _():
        acc_ref[...] = jnp.zeros_like(acc_ref)

    # bf16 A_hat tile x bf16 XW tile -> fp32 accumulator (dominant, mem-bound term).
    acc_ref[...] += jnp.dot(a_ref[...], xw_ref[...],
                            preferred_element_type=jnp.float32)

    @pl.when(k == pl.num_programs(1) - 1)
    def _():
        h = acc_ref[...] + b_ref[...]
        if apply_act:
            h = jnp.where(h > 0, h, NEG_SLOPE * h)
        o_ref[...] = h.astype(o_ref.dtype)


def _gcn_spmm(a_hat, xw, b, *, apply_act, out_dtype):
    n_pad = a_hat.shape[0]
    h_pad = xw.shape[1]

    # Large tiles (mem-bound roofline), but keep >=2 row tiles for v7x megacore
    # and stay well under the 64 MiB v7x VMEM (tm=1024,tk=2048 -> ~11 MiB live).
    tm = 128
    for c in (1024, 512, 256):
        if n_pad % c == 0 and n_pad // c >= 2:
            tm = c
            break
    tk = 128
    for c in (2048, 1024, 512, 256):
        if n_pad % c == 0:
            tk = c
            break
    grid = (n_pad // tm, n_pad // tk)

    cost = pl.CostEstimate(
        flops=int(2 * n_pad * n_pad * h_pad),
        transcendentals=0,
        bytes_accessed=int(n_pad * n_pad * a_hat.dtype.itemsize
                           + n_pad * h_pad * xw.dtype.itemsize * grid[0]
                           + n_pad * h_pad * jnp.dtype(out_dtype).itemsize),
    )

    kernel = functools.partial(gcn_spmm_kernel, apply_act=apply_act)
    return pl.pallas_call(
        kernel,
        out_shape=jax.ShapeDtypeStruct((n_pad, h_pad), out_dtype),
        grid_spec=pltpu.PrefetchScalarGridSpec(
            num_scalar_prefetch=0,
            grid=grid,
            in_specs=[
                pl.BlockSpec((tm, tk), lambda i, k: (i, k)),      # A_hat tile (bf16)
                pl.BlockSpec((tk, h_pad), lambda i, k: (k, 0)),   # XW src tile (bf16)
                pl.BlockSpec((1, h_pad), lambda i, k: (0, 0)),    # bias (f32)
            ],
            out_specs=pl.BlockSpec((tm, h_pad), lambda i, k: (i, 0)),
            scratch_shapes=[pltpu.VMEM((tm, h_pad), jnp.float32)],
        ),
        compiler_params=pltpu.CompilerParams(
            dimension_semantics=("parallel", "arbitrary"),
            vmem_limit_bytes=48 * 1024 * 1024,
        ),
        cost_estimate=cost,
    )(a_hat, xw, b)


# ----------------------------------------------------------------------------
# Glue: normalized adjacency, padding, layer orchestration.
# ----------------------------------------------------------------------------
def gcn_norm_adj(edge_index, num_nodes, num_nodes_pad):
    """Dense D^{-1/2}(A+I)D^{-1/2}, zero-padded to (num_nodes_pad,)^2, bf16.

    A_hat[dst, src]; duplicate edges accumulate weight (matches PyG scatter-add).
    """
    # TODO(synk): for large/sparse graphs, replace the dense O(N^2) adjacency
    #             with a CSR row-pointer/neighbor table + scalar-prefetch gather.
    src = edge_index[0]
    dst = edge_index[1]
    loop = jnp.arange(num_nodes, dtype=edge_index.dtype)
    src = jnp.concatenate([src, loop])
    dst = jnp.concatenate([dst, loop])
    adj = jnp.zeros((num_nodes, num_nodes), jnp.float32).at[dst, src].add(1.0)
    deg = adj.sum(axis=1)
    dinv = jnp.where(deg > 0, 1.0 / jnp.sqrt(deg), 0.0)
    a_hat = dinv[:, None] * adj * dinv[None, :]
    pad = num_nodes_pad - num_nodes
    a_hat = jnp.pad(a_hat, ((0, pad), (0, pad)))
    return a_hat.astype(jnp.bfloat16)


def graph_module_forward(x, edge_index, params):
    """x: (N, Cin) float32, edge_index: (2, E) int32. Returns (N, Cout) float32."""
    n, cin = x.shape
    w1, b1, w2, b2 = params
    hidden = w1.shape[1]
    cout = w2.shape[1]

    n_pad = _round_up(n, 128)
    cin_pad = _round_up(cin, 128)
    hid_pad = _round_up(hidden, 128)
    cout_pad = _round_up(cout, 128)

    a_hat = gcn_norm_adj(edge_index, n, n_pad)

    # Zero-pad to lane-dense 128-multiples; MXU side-inputs in bf16, biases fp32.
    x_p = jnp.pad(x.astype(jnp.float32),
                  ((0, n_pad - n), (0, cin_pad - cin))).astype(jnp.bfloat16)
    w1_p = jnp.pad(w1, ((0, cin_pad - cin), (0, hid_pad - hidden))).astype(jnp.bfloat16)
    b1_p = jnp.pad(b1, ((0, 0), (0, hid_pad - hidden)))
    w2_p = jnp.pad(w2, ((0, hid_pad - hidden), (0, cout_pad - cout))).astype(jnp.bfloat16)
    b2_p = jnp.pad(b2, ((0, 0), (0, cout_pad - cout)))

    if n_pad <= FUSED_MAX_N_PAD:
        # Single fused kernel: A_hat read once, hidden h never leaves VMEM.
        out = _fused_forward(a_hat, x_p, w1_p, b1_p, w2_p, b2_p)
    else:
        # Hoisted X@W pre-passes (tiny fraction of FLOPs; plain XLA, bf16 result),
        # then the streaming A_hat kernels.  Layer-1 output stays bf16.
        xw1 = jnp.dot(x_p, w1_p, preferred_element_type=jnp.float32).astype(jnp.bfloat16)
        h = _gcn_spmm(a_hat, xw1, b1_p, apply_act=True, out_dtype=jnp.bfloat16)
        hw2 = jnp.dot(h, w2_p, preferred_element_type=jnp.float32).astype(jnp.bfloat16)
        out = _gcn_spmm(a_hat, hw2, b2_p, apply_act=False, out_dtype=jnp.float32)

    return out[:n, :cout]


def init_params(key, in_channels, hidden, out_channels):
    """Deterministic glorot-uniform init, like PyG GCNConv (bias=0)."""
    k1, k2 = jax.random.split(key)

    def glorot(k, fan_in, fan_out):
        limit = jnp.sqrt(6.0 / (fan_in + fan_out))
        return jax.random.uniform(k, (fan_in, fan_out), jnp.float32,
                                  minval=-limit, maxval=limit)

    w1 = glorot(k1, in_channels, hidden)
    b1 = jnp.zeros((1, hidden), jnp.float32)
    w2 = glorot(k2, hidden, out_channels)
    b2 = jnp.zeros((1, out_channels), jnp.float32)
    return (w1, b1, w2, b2)


if __name__ == "__main__":
    key = jax.random.PRNGKey(0)
    k_x, k_e, k_p = jax.random.split(key, 3)

    num_nodes = 16
    input_channels = 4
    hidden_channels = 8
    output_channels = 4
    num_edges = 24

    x = jax.random.normal(k_x, (num_nodes, input_channels), jnp.float32)
    edge_index = jax.random.randint(k_e, (2, num_edges), 0, num_nodes,
                                    dtype=jnp.int32)
    params = init_params(k_p, input_channels, hidden_channels, output_channels)

    fwd = jax.jit(graph_module_forward)
    out = fwd(x, edge_index, params)
    jax.block_until_ready(out)
    assert out.shape == (num_nodes, output_channels)
    print("KERNEL_OK")
</pallas_src>

<mosaic_0001>
module attributes {stable_mosaic.version = 11 : i64} {
  func.func @fused_gcn_kernel(%arg0: i32, %arg1: memref<128x128xbf16, #tpu.memory_space<vmem>>, %arg2: memref<128x128xbf16, #tpu.memory_space<vmem>>, %arg3: memref<128x128xbf16, #tpu.memory_space<vmem>>, %arg4: memref<1x128xf32, #tpu.memory_space<vmem>>, %arg5: memref<128x128xbf16, #tpu.memory_space<vmem>>, %arg6: memref<1x128xf32, #tpu.memory_space<vmem>>, %arg7: memref<128x128xf32, #tpu.memory_space<vmem>>) attributes {dimension_semantics = [#tpu.dimension_semantics<arbitrary>], iteration_bounds = array<i64: 1>, scalar_prefetch = 0 : i64, scratch_operands = 0 : i64, tpu.core_type = #tpu.core_type<tc>, window_params = [{pipeline_mode = #tpu.pipeline_mode<synchronous>, transform_indices = @transform_0, window_bounds = array<i64: 128, 128>}, {pipeline_mode = #tpu.pipeline_mode<synchronous>, transform_indices = @transform_1, window_bounds = array<i64: 128, 128>}, {pipeline_mode = #tpu.pipeline_mode<synchronous>, transform_indices = @transform_2, window_bounds = array<i64: 128, 128>}, {pipeline_mode = #tpu.pipeline_mode<synchronous>, transform_indices = @transform_3, window_bounds = array<i64: 1, 128>}, {pipeline_mode = #tpu.pipeline_mode<synchronous>, transform_indices = @transform_4, window_bounds = array<i64: 128, 128>}, {pipeline_mode = #tpu.pipeline_mode<synchronous>, transform_indices = @transform_5, window_bounds = array<i64: 1, 128>}, {pipeline_mode = #tpu.pipeline_mode<synchronous>, transform_indices = @transform_6, window_bounds = array<i64: 128, 128>}]} {
    %c0 = arith.constant 0 : index
    %c0_0 = arith.constant 0 : index
    %0 = vector.load %arg1[%c0, %c0_0] : memref<128x128xbf16, #tpu.memory_space<vmem>>, vector<128x128xbf16>
    %c0_1 = arith.constant 0 : index
    %c0_2 = arith.constant 0 : index
    %1 = vector.load %arg2[%c0_1, %c0_2] : memref<128x128xbf16, #tpu.memory_space<vmem>>, vector<128x128xbf16>
    %c0_3 = arith.constant 0 : index
    %c0_4 = arith.constant 0 : index
    %2 = vector.load %arg3[%c0_3, %c0_4] : memref<128x128xbf16, #tpu.memory_space<vmem>>, vector<128x128xbf16>
    %cst = arith.constant dense<0.000000e+00> : vector<128x128xf32>
    %3 = tpu.matmul %1, %2, %cst {dimension_numbers = #tpu.dot_dimension_numbers<[1], [0], [0], [1], [0, 0, 1, 1], [], []>} : vector<128x128xbf16>, vector<128x128xbf16>, vector<128x128xf32> -> vector<128x128xf32>
    %4 = arith.truncf %3 : vector<128x128xf32> to vector<128x128xbf16>
    %cst_5 = arith.constant dense<0.000000e+00> : vector<128x128xf32>
    %5 = tpu.matmul %0, %4, %cst_5 {dimension_numbers = #tpu.dot_dimension_numbers<[1], [0], [0], [1], [0, 0, 1, 1], [], []>} : vector<128x128xbf16>, vector<128x128xbf16>, vector<128x128xf32> -> vector<128x128xf32>
    %c0_6 = arith.constant 0 : index
    %c0_7 = arith.constant 0 : index
    %6 = vector.load %arg4[%c0_6, %c0_7] : memref<1x128xf32, #tpu.memory_space<vmem>>, vector<1x128xf32>
    %7 = vector.broadcast %6 : vector<1x128xf32> to vector<128x128xf32>
    %8 = arith.addf %5, %7 : vector<128x128xf32>
    %cst_8 = arith.constant 0.000000e+00 : f32
    %9 = vector.broadcast %cst_8 : f32 to vector<128x128xf32>
    %10 = arith.cmpf ogt, %8, %9 : vector<128x128xf32>
    %cst_9 = arith.constant 0.00999999977 : f32
    %11 = vector.broadcast %cst_9 : f32 to vector<128x128xf32>
    %12 = arith.mulf %11, %8 : vector<128x128xf32>
    %13 = arith.select %10, %8, %12 : vector<128x128xi1>, vector<128x128xf32>
    %14 = arith.truncf %13 : vector<128x128xf32> to vector<128x128xbf16>
    %c0_10 = arith.constant 0 : index
    %c0_11 = arith.constant 0 : index
    %15 = vector.load %arg5[%c0_10, %c0_11] : memref<128x128xbf16, #tpu.memory_space<vmem>>, vector<128x128xbf16>
    %cst_12 = arith.constant dense<0.000000e+00> : vector<128x128xf32>
    %16 = tpu.matmul %14, %15, %cst_12 {dimension_numbers = #tpu.dot_dimension_numbers<[1], [0], [0], [1], [0, 0, 1, 1], [], []>} : vector<128x128xbf16>, vector<128x128xbf16>, vector<128x128xf32> -> vector<128x128xf32>
    %17 = arith.truncf %16 : vector<128x128xf32> to vector<128x128xbf16>
    %cst_13 = arith.constant dense<0.000000e+00> : vector<128x128xf32>
    %18 = tpu.matmul %0, %17, %cst_13 {dimension_numbers = #tpu.dot_dimension_numbers<[1], [0], [0], [1], [0, 0, 1, 1], [], []>} : vector<128x128xbf16>, vector<128x128xbf16>, vector<128x128xf32> -> vector<128x128xf32>
    %c0_14 = arith.constant 0 : index
    %c0_15 = arith.constant 0 : index
    %19 = vector.load %arg6[%c0_14, %c0_15] : memref<1x128xf32, #tpu.memory_space<vmem>>, vector<1x128xf32>
    %20 = vector.broadcast %19 : vector<1x128xf32> to vector<128x128xf32>
    %21 = arith.addf %18, %20 : vector<128x128xf32>
    %c0_16 = arith.constant 0 : index
    %c0_17 = arith.constant 0 : index
    %22 = vector.load %arg7[%c0_16, %c0_17] : memref<128x128xf32, #tpu.memory_space<vmem>>, vector<128x128xf32>
    tpu.vector_store %arg7[%c0_16, %c0_17], %21 {strides = array<i32>} : memref<128x128xf32, #tpu.memory_space<vmem>>, vector<128x128xf32>,
    return
  }
  func.func @transform_0(%arg0: i32) -> (i32, i32) {
    %c0_i32 = arith.constant 0 : i32
    %c0_i32_0 = arith.constant 0 : i32
    %c0_i32_1 = arith.constant 0 : i32
    return %c0_i32, %c0_i32_0 : i32, i32
  }
  func.func @transform_1(%arg0: i32) -> (i32, i32) {
    %c0_i32 = arith.constant 0 : i32
    %c0_i32_0 = arith.constant 0 : i32
    %c0_i32_1 = arith.constant 0 : i32
    return %c0_i32, %c0_i32_0 : i32, i32
  }
  func.func @transform_2(%arg0: i32) -> (i32, i32) {
    %c0_i32 = arith.constant 0 : i32
    %c0_i32_0 = arith.constant 0 : i32
    %c0_i32_1 = arith.constant 0 : i32
    return %c0_i32, %c0_i32_0 : i32, i32
  }
  func.func @transform_3(%arg0: i32) -> (i32, i32) {
    %c0_i32 = arith.constant 0 : i32
    %c0_i32_0 = arith.constant 0 : i32
    %c0_i32_1 = arith.constant 0 : i32
    return %c0_i32, %c0_i32_0 : i32, i32
  }
  func.func @transform_4(%arg0: i32) -> (i32, i32) {
    %c0_i32 = arith.constant 0 : i32
    %c0_i32_0 = arith.constant 0 : i32
    %c0_i32_1 = arith.constant 0 : i32
    return %c0_i32, %c0_i32_0 : i32, i32
  }
  func.func @transform_5(%arg0: i32) -> (i32, i32) {
    %c0_i32 = arith.constant 0 : i32
    %c0_i32_0 = arith.constant 0 : i32
    %c0_i32_1 = arith.constant 0 : i32
    return %c0_i32, %c0_i32_0 : i32, i32
  }
  func.func @transform_6(%arg0: i32) -> (i32, i32) {
    %c0_i32 = arith.constant 0 : i32
    %c0_i32_0 = arith.constant 0 : i32
    %c0_i32_1 = arith.constant 0 : i32
    return %c0_i32, %c0_i32_0 : i32, i32
  }
}

</mosaic_0001>

<bundles_post_ra>
// kernel: graph_module_forward.1
= control target key start
LH: loop header
LB: loop body
LE: loop exit
PB: predicated region body
PF: predicated region fallthrough
CT: control target
= control target key end

     0   :  { %s1267_s2 = inlined_call_operand.vmem [shape: bf16[128,128], index: 2, kind: input, shape index: {}]   ;;  %s1268_s1 = inlined_call_operand.vmem [shape: bf16[128,128], index: 1, kind: input, shape index: {}]   ;;  %s1269_s0 = inlined_call_operand.vmem [shape: bf16[128,128], index: 0, kind: input, shape index: {}]   ;;  %s1270_s4 = inlined_call_operand.vmem [shape: bf16[128,128], index: 4, kind: input, shape index: {}]   ;;  %s1271_s3 = inlined_call_operand.vmem [shape: f32[1,128], index: 3, kind: input, shape index: {}]   ;;  %s1272_s5 = inlined_call_operand.vmem [shape: f32[1,128], index: 5, kind: input, shape index: {}]   ;;  %s1273_s6 = inlined_call_operand.vmem [shape: f32[128,128], index: 6, kind: output, shape index: {}]  }
   0x1   :  { %v1000_v0 = vld [vmem:[%s1267_s2] sm:$0xff]   ;;  %v1001_v1 = vld [vmem:[%s1267_s2 + $0x8] sm:$0xff]   ;;  %v1002_v2 = vld [vmem:[%s1267_s2 + $0x10] sm:$0xff]  }
   0x2   :  { %872 = vmatprep.subr.bf16.mxu0 %v1000_v0  ;;  %v1003_v3 = vld [vmem:[%s1267_s2 + $0x18] sm:$0xff]   ;;  %v1008_v4 = vld [vmem:[%s1268_s1] sm:$0xff]   ;;  %v1005_v6 = vld [vmem:[%s1267_s2 + $0x28] sm:$0xff]  }
   0x3   :  { %873 = vmatpush3.bf16.msra.mxu0 %v1000_v0  ;;  %888 = vmatprep.mubr.bf16.mxu0 %v1008_v4  ;;  %v1004_v5 = vld [vmem:[%s1267_s2 + $0x20] sm:$0xff]   ;;  %v1006_v7 = vld [vmem:[%s1267_s2 + $0x30] sm:$0xff]   ;;  %v1007_v8 = vld [vmem:[%s1267_s2 + $0x38] sm:$0xff]  }
   0x4   :  { %874 = vmatprep.subr.bf16.mxu0 %v1001_v1  ;;  %v1009_v9 = vld [vmem:[%s1268_s1 + $0x8] sm:$0xff]   ;;  %v1010_v10 = vld [vmem:[%s1268_s1 + $0x10] sm:$0xff]   ;;  %v1011_v11 = vld [vmem:[%s1268_s1 + $0x18] sm:$0xff]  }
   0x5   :  { %v1012_v12 = vld [vmem:[%s1268_s1 + $0x20] sm:$0xff]   ;;  %v1013_v13 = vld [vmem:[%s1268_s1 + $0x28] sm:$0xff]   ;;  %v1014_v14 = vld [vmem:[%s1268_s1 + $0x30] sm:$0xff]  }
   0x6   :  { %v1015_v15 = vld [vmem:[%s1268_s1 + $0x38] sm:$0xff]   ;;  %v1118_v16 = vld [vmem:[%s1269_s0] sm:$0xff]   ;;  %v1025_v18 = vld [vmem:[%s1270_s4 + $0x8] sm:$0xff]  }
   0x7   :  { %875 = vmatpush3.bf16.msra.mxu0 %v1001_v1  ;;  %920 = vmatprep.mubr.bf16.mxu1 %v1118_v16  ;;  %v1024_v17 = vld [vmem:[%s1270_s4] sm:$0xff]   ;;  %v1026_v19 = vld [vmem:[%s1270_s4 + $0x10] sm:$0xff]   ;;  %v1027_v20 = vld [vmem:[%s1270_s4 + $0x18] sm:$0xff]  }
   0x8   :  { %876 = vmatprep.subr.bf16.mxu0 %v1002_v2  ;;  %v1028_v21 = vld [vmem:[%s1270_s4 + $0x20] sm:$0xff]   ;;  %v1139_v46 = vld [vmem:[%s1269_s0 + $0x8] sm:$0xff]   ;;  %v1144_v47 = vld [vmem:[%s1269_s0 + $0x10] sm:$0xff]  }
   0x9   :  { %v1151_v48 = vld [vmem:[%s1269_s0 + $0x18] sm:$0xff]   ;;  %v1156_v49 = vld [vmem:[%s1269_s0 + $0x20] sm:$0xff]   ;;  %v1163_v50 = vld [vmem:[%s1269_s0 + $0x28] sm:$0xff]  }
   0xa   :  { %v1168_v51 = vld [vmem:[%s1269_s0 + $0x30] sm:$0xff]   ;;  %v1175_v52 = vld [vmem:[%s1269_s0 + $0x38] sm:$0xff]   ;;  %v1029_v53 = vld [vmem:[%s1270_s4 + $0x28] sm:$0xff]  }
   0xb   :  { %877 = vmatpush3.bf16.msra.mxu0 %v1002_v2  ;;  %v1030_v54 = vld [vmem:[%s1270_s4 + $0x30] sm:$0xff]   ;;  %v1031_v55 = vld [vmem:[%s1270_s4 + $0x38] sm:$0xff]   ;;  %v1191_v56 = vld [vmem:[%s1271_s3] ss:$0 sm:$0xff] }
   0xc   :  { %878 = vmatprep.subr.bf16.mxu0 %v1003_v3 }
   0xf   :  { %879 = vmatpush3.bf16.msra.mxu0 %v1003_v3 }
  0x10   :  { %880 = vmatprep.subr.bf16.mxu0 %v1004_v5 }
  0x13   :  { %881 = vmatpush3.bf16.msra.mxu0 %v1004_v5 }
  0x14   :  { %882 = vmatprep.subr.bf16.mxu0 %v1005_v6 }
  0x17   :  { %883 = vmatpush3.bf16.msra.mxu0 %v1005_v6 }
  0x18   :  { %884 = vmatprep.subr.bf16.mxu0 %v1006_v7 }
  0x1b   :  { %885 = vmatpush3.bf16.msra.mxu0 %v1006_v7 }
  0x1c   :  { %886 = vmatprep.subr.bf16.mxu0 %v1007_v8 }
  0x1f   :  { %887 = vmatpush3.bf16.msra.mxu0 %v1007_v8 }
  0x20   :  { %936 = vmatprep.subr.bf16.mxu0 %v1024_v17 }
  0x22   :  { %889 = vmatmul.mubr.bf16.vlgmr.msra.gmra.mrb[0].mxu0 %v1009_v9 }
  0x23   :  { %892 = vmatprep.mubr.bf16.mxu0 %v1010_v10  ;;  %937 = vmatpush3.bf16.msra.mxu0 %v1024_v17 }
  0x24   :  { %938 = vmatprep.subr.bf16.mxu0 %v1025_v18 }
  0x27   :  { %939 = vmatpush3.bf16.msra.mxu0 %v1025_v18 }
  0x28   :  { %940 = vmatprep.subr.bf16.mxu0 %v1026_v19 }
  0x2a   :  { %893 = vmatmul.mubr.bf16.gmra.mrb[4].mxu0 %v1011_v11 }
  0x2b   :  { %896 = vmatprep.mubr.bf16.mxu0 %v1012_v12  ;;  %941 = vmatpush3.bf16.msra.mxu0 %v1026_v19 }
  0x2c   :  { %942 = vmatprep.subr.bf16.mxu0 %v1027_v20 }
  0x2f   :  { %943 = vmatpush3.bf16.msra.mxu0 %v1027_v20 }
  0x30   :  { %944 = vmatprep.subr.bf16.mxu0 %v1028_v21 }
  0x32   :  { %897 = vmatmul.mubr.bf16.gmra.mrb[8].mxu0 %v1013_v13 }
  0x33   :  { %900 = vmatprep.mubr.bf16.mxu0 %v1014_v14  ;;  %945 = vmatpush3.bf16.msra.mxu0 %v1028_v21 }
  0x34   :  { %946 = vmatprep.subr.bf16.mxu0 %v1029_v53 }
  0x37   :  { %947 = vmatpush3.bf16.msra.mxu0 %v1029_v53 }
  0x38   :  { %948 = vmatprep.subr.bf16.mxu0 %v1030_v54 }
  0x3a   :  { %901 = vmatmul.mubr.bf16.gmra.mrb[12].mxu0 %v1015_v15 }
  0x3b   :  { %949 = vmatpush3.bf16.msra.mxu0 %v1030_v54 }
  0x3c   :  { %950 = vmatprep.subr.bf16.mxu0 %v1031_v55 }
  0x3f   :  { %951 = vmatpush3.bf16.msra.mxu0 %v1031_v55 }
  0xf5   :  { %v890_v22 = vpop.f32.mrb[0].mxu0 }
  0xf6   :  { %v202_v23 = vpop.f32.mrb[1].mxu0 }
  0xf7   :  { %v891_v24 = vpop.f32.mrb[2].mxu0 }
  0xf8   :  { %v266_v25 = vpack.c.bf16 %v891_v24, %v890_v22  ;;  %v205_v26 = vpop.f32.mrb[3].mxu0 }
  0xf9   :  { %v265_v27 = vpack.c.bf16 %v205_v26, %v202_v23 }
  0xfb   :  { %904 = vmatprep.subr.bf16.mxu1 %v265_v27 }
  0xfc   :  { %905 = vmatpush3.bf16.msra.mxu1 %v265_v27 }
  0xfd   :  { %v894_v28 = vpop.f32.mrb[4].mxu0  ;;  %906 = vmatprep.subr.bf16.mxu1 %v266_v25 }
  0xfe   :  { %v218_v29 = vpop.f32.mrb[5].mxu0 }
  0xff   :  { %v895_v30 = vpop.f32.mrb[6].mxu0 }
 0x100   :  { %v268_v31 = vpack.c.bf16 %v895_v30, %v894_v28  ;;  %v221_v32 = vpop.f32.mrb[7].mxu0  ;;  %907 = vmatpush3.bf16.msra.mxu1 %v266_v25 }
 0x101   :  { %v267_v33 = vpack.c.bf16 %v221_v32, %v218_v29 }
 0x103   :  { %908 = vmatprep.subr.bf16.mxu1 %v267_v33 }
 0x104   :  { %909 = vmatpush3.bf16.msra.mxu1 %v267_v33 }
 0x105   :  { %v898_v34 = vpop.f32.mrb[8].mxu0  ;;  %910 = vmatprep.subr.bf16.mxu1 %v268_v31 }
 0x106   :  { %v234_v35 = vpop.f32.mrb[9].mxu0 }
 0x107   :  { %v899_v36 = vpop.f32.mrb[10].mxu0 }
 0x108   :  { %v270_v37 = vpack.c.bf16 %v899_v36, %v898_v34  ;;  %v237_v38 = vpop.f32.mrb[11].mxu0  ;;  %911 = vmatpush3.bf16.msra.mxu1 %v268_v31 }
 0x109   :  { %v269_v39 = vpack.c.bf16 %v237_v38, %v234_v35 }
 0x10b   :  { %912 = vmatprep.subr.bf16.mxu1 %v269_v39 }
 0x10c   :  { %913 = vmatpush3.bf16.msra.mxu1 %v269_v39 }
 0x10d   :  { %v902_v40 = vpop.f32.mrb[12].mxu0  ;;  %914 = vmatprep.subr.bf16.mxu1 %v270_v37 }
 0x10e   :  { %v250_v41 = vpop.f32.mrb[13].mxu0 }
 0x10f   :  { %v903_v42 = vpop.f32.mrb[14].mxu0 }
 0x110   :  { %v272_v43 = vpack.c.bf16 %v903_v42, %v902_v40  ;;  %v253_v44 = vpop.f32.mrb[15].mxu0  ;;  %915 = vmatpush3.bf16.msra.mxu1 %v270_v37 }
 0x111   :  { %v271_v45 = vpack.c.bf16 %v253_v44, %v250_v41 }
 0x113   :  { %916 = vmatprep.subr.bf16.mxu1 %v271_v45 }
 0x114   :  { %917 = vmatpush3.bf16.msra.mxu1 %v271_v45 }
 0x115   :  { %918 = vmatprep.subr.bf16.mxu1 %v272_v43 }
 0x118   :  { %919 = vmatpush3.bf16.msra.mxu1 %v272_v43 }
 0x11b   :  { %921 = vmatmul.mubr.bf16.vlgmr.msra.gmra.mrb[0].mxu1 %v1139_v46 }
 0x11c   :  { %924 = vmatprep.mubr.bf16.mxu1 %v1144_v47 }
 0x123   :  { %925 = vmatmul.mubr.bf16.gmra.mrb[4].mxu1 %v1151_v48 }
 0x124   :  { %928 = vmatprep.mubr.bf16.mxu1 %v1156_v49 }
 0x12b   :  { %929 = vmatmul.mubr.bf16.gmra.mrb[8].mxu1 %v1163_v50 }
 0x12c   :  { %932 = vmatprep.mubr.bf16.mxu1 %v1168_v51 }
 0x133   :  { %933 = vmatmul.mubr.bf16.gmra.mrb[12].mxu1 %v1175_v52 }
 0x134   :  { %984 = vmatprep.mubr.bf16.mxu1 %v1118_v16 }
 0x1ee   :  { %v922_v57 = vpop.f32.mrb[0].mxu1 }
 0x1ef   :  { %v371_v58 = vadd.f32 %v922_v57, %v1191_v56  ;;  %v362_v59 = vpop.f32.mrb[1].mxu1 }
 0x1f0   :  { %v363_v60 = vadd.f32 %v1191_v56, %v362_v59  ;;  %v923_v61 = vpop.f32.mrb[2].mxu1 }
 0x1f1   :  { %v443_v62 = vmul.f32 0.01, %v371_v58  ;;  %v374_v63 = vadd.f32 %v923_v61, %v1191_v56  ;;  %v365_v0 = vpop.f32.mrb[3].mxu1  ;;  %vm427_vm0 = vcmp.gt.f32.partialorder %v371_v58, 0.0 }
 0x1f2   :  { %v441_v1 = vmul.f32 0.01, %v363_v60  ;;  %v366_v2 = vadd.f32 %v1191_v56, %v365_v0  ;;  %vm425_vm1 = vcmp.gt.f32.partialorder %v363_v60, 0.0 }
 0x1f3   :  { %vm428_vm2 = vcmp.gt.f32.partialorder %v374_v63, 0.0  ;;  %v444_v3 = vmul.f32 0.01, %v374_v63  ;;  %v459_v5 = vsel %vm427_vm0, %v371_v58, %v443_v62 }
 0x1f4   :  { %vm426_vm3 = vcmp.gt.f32.partialorder %v366_v2, 0.0  ;;  %v442_v4 = vmul.f32 0.01, %v366_v2  ;;  %v457_v9 = vsel %vm425_vm1, %v363_v60, %v441_v1 }
 0x1f5   :  { %v460_v6 = vsel %vm428_vm2, %v374_v63, %v444_v3 }
 0x1f6   :  { %v474_v7 = vpack.c.bf16 %v460_v6, %v459_v5  ;;  %v926_v8 = vpop.f32.mrb[4].mxu1  ;;  %v458_v10 = vsel %vm426_vm3, %v366_v2, %v442_v4 }
 0x1f7   :  { %v387_v11 = vadd.f32 %v926_v8, %v1191_v56  ;;  %v378_v12 = vpop.f32.mrb[5].mxu1  ;;  %v473_v13 = vpack.c.bf16 %v458_v10, %v457_v9 }
 0x1f8   :  { %v379_v14 = vadd.f32 %v1191_v56, %v378_v12  ;;  %v927_v15 = vpop.f32.mrb[6].mxu1 }
 0x1f9   :  { %v447_v16 = vmul.f32 0.01, %v387_v11  ;;  %v390_v17 = vadd.f32 %v927_v15, %v1191_v56  ;;  %v381_v18 = vpop.f32.mrb[7].mxu1  ;;  %952 = vmatprep.mubr.bf16.mxu0 %v473_v13  ;;  %vm431_vm4 = vcmp.gt.f32.partialorder %v387_v11, 0.0 }
 0x1fa   :  { %v445_v19 = vmul.f32 0.01, %v379_v14  ;;  %v382_v20 = vadd.f32 %v1191_v56, %v381_v18  ;;  %953 = vmatmul.mubr.bf16.vlgmr.msra.gmra.mrb[16].mxu0 %v474_v7  ;;  %vm429_vm5 = vcmp.gt.f32.partialorder %v379_v14, 0.0 }
 0x1fb   :  { %vm432_vm6 = vcmp.gt.f32.partialorder %v390_v17, 0.0  ;;  %v448_v21 = vmul.f32 0.01, %v390_v17  ;;  %v463_v23 = vsel %vm431_vm4, %v387_v11, %v447_v16 }
 0x1fc   :  { %vm430_vm7 = vcmp.gt.f32.partialorder %v382_v20, 0.0  ;;  %v446_v22 = vmul.f32 0.01, %v382_v20  ;;  %v461_v26 = vsel %vm429_vm5, %v379_v14, %v445_v19 }
 0x1fd   :  { %v464_v24 = vsel %vm432_vm6, %v390_v17, %v448_v21 }
 0x1fe   :  { %v930_v25 = vpop.f32.mrb[8].mxu1  ;;  %v462_v27 = vsel %vm430_vm7, %v382_v20, %v446_v22  ;;  %v476_v28 = vpack.c.bf16 %v464_v24, %v463_v23 }
 0x1ff   :  { %v403_v29 = vadd.f32 %v930_v25, %v1191_v56  ;;  %v394_v30 = vpop.f32.mrb[9].mxu1  ;;  %v475_v31 = vpack.c.bf16 %v462_v27, %v461_v26 }
 0x200   :  { %v395_v32 = vadd.f32 %v1191_v56, %v394_v30  ;;  %v931_v33 = vpop.f32.mrb[10].mxu1 }
 0x201   :  { %v451_v34 = vmul.f32 0.01, %v403_v29  ;;  %v406_v35 = vadd.f32 %v931_v33, %v1191_v56  ;;  %v397_v36 = vpop.f32.mrb[11].mxu1  ;;  %956 = vmatprep.mubr.bf16.mxu0 %v475_v31  ;;  %vm435_vm8 = vcmp.gt.f32.partialorder %v403_v29, 0.0 }
 0x202   :  { %v449_v37 = vmul.f32 0.01, %v395_v32  ;;  %v398_v38 = vadd.f32 %v1191_v56, %v397_v36  ;;  %957 = vmatmul.mubr.bf16.gmra.mrb[20].mxu0 %v476_v28  ;;  %vm433_vm9 = vcmp.gt.f32.partialorder %v395_v32, 0.0 }
 0x203   :  { %vm436_vm10 = vcmp.gt.f32.partialorder %v406_v35, 0.0  ;;  %v452_v39 = vmul.f32 0.01, %v406_v35  ;;  %v467_v41 = vsel %vm435_vm8, %v403_v29, %v451_v34 }
 0x204   :  { %vm434_vm11 = vcmp.gt.f32.partialorder %v398_v38, 0.0  ;;  %v450_v40 = vmul.f32 0.01, %v398_v38  ;;  %v465_v44 = vsel %vm433_vm9, %v395_v32, %v449_v37  ;;  %v807_v32 = vld [vmem:[%s1272_s5] ss:$0 sm:$0xff] }
 0x205   :  { %v468_v42 = vsel %vm436_vm10, %v406_v35, %v452_v39 }
 0x206   :  { %v934_v43 = vpop.f32.mrb[12].mxu1  ;;  %v466_v45 = vsel %vm434_vm11, %v398_v38, %v450_v40  ;;  %v478_v53 = vpack.c.bf16 %v468_v42, %v467_v41 }
 0x207   :  { %v419_v54 = vadd.f32 %v934_v43, %v1191_v56  ;;  %v410_v55 = vpop.f32.mrb[13].mxu1  ;;  %v477_v57 = vpack.c.bf16 %v466_v45, %v465_v44 }
 0x208   :  { %v411_v58 = vadd.f32 %v1191_v56, %v410_v55  ;;  %v935_v59 = vpop.f32.mrb[14].mxu1 }
 0x209   :  { %v455_v60 = vmul.f32 0.01, %v419_v54  ;;  %v422_v61 = vadd.f32 %v935_v59, %v1191_v56  ;;  %v413_v62 = vpop.f32.mrb[15].mxu1  ;;  %960 = vmatprep.mubr.bf16.mxu0 %v477_v57  ;;  %vm439_vm12 = vcmp.gt.f32.partialorder %v419_v54, 0.0 }
 0x20a   :  { %v453_v63 = vmul.f32 0.01, %v411_v58  ;;  %v414_v0 = vadd.f32 %v1191_v56, %v413_v62  ;;  %961 = vmatmul.mubr.bf16.gmra.mrb[24].mxu0 %v478_v53  ;;  %vm437_vm13 = vcmp.gt.f32.partialorder %v411_v58, 0.0 }
 0x20b   :  { %vm440_vm14 = vcmp.gt.f32.partialorder %v422_v61, 0.0  ;;  %v456_v1 = vmul.f32 0.01, %v422_v61  ;;  %v471_v3 = vsel %vm439_vm12, %v419_v54, %v455_v60 }
 0x20c   :  { %vm438_vm15 = vcmp.gt.f32.partialorder %v414_v0, 0.0  ;;  %v454_v2 = vmul.f32 0.01, %v414_v0  ;;  %v469_v5 = vsel %vm437_vm13, %v411_v58, %v453_v63 }
 0x20d   :  { %v472_v4 = vsel %vm440_vm14, %v422_v61, %v456_v1 }
 0x20e   :  { %v470_v6 = vsel %vm438_vm15, %v414_v0, %v454_v2  ;;  %v480_v7 = vpack.c.bf16 %v472_v4, %v471_v3 }
 0x20f   :  { %v479_v8 = vpack.c.bf16 %v470_v6, %v469_v5 }
 0x211   :  { %964 = vmatprep.mubr.bf16.mxu0 %v479_v8 }
 0x212   :  { %965 = vmatmul.mubr.bf16.gmra.mrb[28].mxu0 %v480_v7 }
 0x2cd   :  { %v954_v9 = vpop.f32.mrb[16].mxu0 }
 0x2ce   :  { %v579_v10 = vpop.f32.mrb[17].mxu0 }
 0x2cf   :  { %v955_v11 = vpop.f32.mrb[18].mxu0 }
 0x2d0   :  { %v643_v12 = vpack.c.bf16 %v955_v11, %v954_v9  ;;  %v582_v13 = vpop.f32.mrb[19].mxu0 }
 0x2d1   :  { %v642_v56 = vpack.c.bf16 %v582_v13, %v579_v10 }
 0x2d3   :  { %968 = vmatprep.subr.bf16.mxu1 %v642_v56 }
 0x2d4   :  { %969 = vmatpush3.bf16.msra.mxu1 %v642_v56 }
 0x2d5   :  { %v958_v14 = vpop.f32.mrb[20].mxu0  ;;  %970 = vmatprep.subr.bf16.mxu1 %v643_v12 }
 0x2d6   :  { %v595_v15 = vpop.f32.mrb[21].mxu0 }
 0x2d7   :  { %v959_v16 = vpop.f32.mrb[22].mxu0 }
 0x2d8   :  { %v645_v17 = vpack.c.bf16 %v959_v16, %v958_v14  ;;  %v598_v18 = vpop.f32.mrb[23].mxu0  ;;  %971 = vmatpush3.bf16.msra.mxu1 %v643_v12 }
 0x2d9   :  { %v644_v19 = vpack.c.bf16 %v598_v18, %v595_v15 }
 0x2db   :  { %972 = vmatprep.subr.bf16.mxu1 %v644_v19 }
 0x2dc   :  { %973 = vmatpush3.bf16.msra.mxu1 %v644_v19 }
 0x2dd   :  { %v962_v20 = vpop.f32.mrb[24].mxu0  ;;  %974 = vmatprep.subr.bf16.mxu1 %v645_v17 }
 0x2de   :  { %v611_v21 = vpop.f32.mrb[25].mxu0 }
 0x2df   :  { %v963_v22 = vpop.f32.mrb[26].mxu0 }
 0x2e0   :  { %v647_v23 = vpack.c.bf16 %v963_v22, %v962_v20  ;;  %v614_v24 = vpop.f32.mrb[27].mxu0  ;;  %975 = vmatpush3.bf16.msra.mxu1 %v645_v17 }
 0x2e1   :  { %v646_v25 = vpack.c.bf16 %v614_v24, %v611_v21 }
 0x2e3   :  { %976 = vmatprep.subr.bf16.mxu1 %v646_v25 }
 0x2e4   :  { %977 = vmatpush3.bf16.msra.mxu1 %v646_v25 }
 0x2e5   :  { %v966_v26 = vpop.f32.mrb[28].mxu0  ;;  %978 = vmatprep.subr.bf16.mxu1 %v647_v23 }
 0x2e6   :  { %v627_v27 = vpop.f32.mrb[29].mxu0 }
 0x2e7   :  { %v967_v28 = vpop.f32.mrb[30].mxu0 }
 0x2e8   :  { %v649_v29 = vpack.c.bf16 %v967_v28, %v966_v26  ;;  %v630_v30 = vpop.f32.mrb[31].mxu0  ;;  %979 = vmatpush3.bf16.msra.mxu1 %v647_v23 }
 0x2e9   :  { %v648_v31 = vpack.c.bf16 %v630_v30, %v627_v27 }
 0x2eb   :  { %980 = vmatprep.subr.bf16.mxu1 %v648_v31 }
 0x2ec   :  { %981 = vmatpush3.bf16.msra.mxu1 %v648_v31 }
 0x2ed   :  { %982 = vmatprep.subr.bf16.mxu1 %v649_v29 }
 0x2f0   :  { %983 = vmatpush3.bf16.msra.mxu1 %v649_v29 }
 0x2f3   :  { %985 = vmatmul.mubr.bf16.vlgmr.msra.gmra.mrb[16].mxu1 %v1139_v46 }
 0x2f4   :  { %988 = vmatprep.mubr.bf16.mxu1 %v1144_v47 }
 0x2fb   :  { %989 = vmatmul.mubr.bf16.gmra.mrb[20].mxu1 %v1151_v48 }
 0x2fc   :  { %992 = vmatprep.mubr.bf16.mxu1 %v1156_v49 }
 0x303   :  { %993 = vmatmul.mubr.bf16.gmra.mrb[24].mxu1 %v1163_v50 }
 0x304   :  { %996 = vmatprep.mubr.bf16.mxu1 %v1168_v51 }
 0x30b   :  { %997 = vmatmul.mubr.bf16.gmra.mrb[28].mxu1 %v1175_v52 }
 0x3c6   :  { %v986_v33 = vpop.f32.mrb[16].mxu1 }
 0x3c7   :  { %v700_v34 = vadd.f32 %v986_v33, %v807_v32  ;;  %v691_v35 = vpop.f32.mrb[17].mxu1 }
 0x3c8   :  { %v692_v46 = vadd.f32 %v807_v32, %v691_v35  ;;  %v987_v36 = vpop.f32.mrb[18].mxu1 }
 0x3c9   :  { %756 = vst [vmem:[%s1273_s6 + $0x10] sm:$0xff] %v700_v34  ;;  %v703_v47 = vadd.f32 %v987_v36, %v807_v32  ;;  %v694_v48 = vpop.f32.mrb[19].mxu1 }
 0x3ca   :  { %754 = vst [vmem:[%s1273_s6] sm:$0xff] %v692_v46  ;;  %v695_v49 = vadd.f32 %v807_v32, %v694_v48 }
 0x3cb   :  { %757 = vst [vmem:[%s1273_s6 + $0x18] sm:$0xff] %v703_v47 }
 0x3cc   :  { %755 = vst [vmem:[%s1273_s6 + $0x8] sm:$0xff] %v695_v49 }
 0x3ce   :  { %v990_v50 = vpop.f32.mrb[20].mxu1 }
 0x3cf   :  { %v716_v51 = vadd.f32 %v990_v50, %v807_v32  ;;  %v707_v52 = vpop.f32.mrb[21].mxu1 }
 0x3d0   :  { %v708_v37 = vadd.f32 %v807_v32, %v707_v52  ;;  %v991_v38 = vpop.f32.mrb[22].mxu1 }
 0x3d1   :  { %760 = vst [vmem:[%s1273_s6 + $0x30] sm:$0xff] %v716_v51  ;;  %v719_v39 = vadd.f32 %v991_v38, %v807_v32  ;;  %v710_v40 = vpop.f32.mrb[23].mxu1 }
 0x3d2   :  { %758 = vst [vmem:[%s1273_s6 + $0x20] sm:$0xff] %v708_v37  ;;  %v711_v41 = vadd.f32 %v807_v32, %v710_v40 }
 0x3d3   :  { %761 = vst [vmem:[%s1273_s6 + $0x38] sm:$0xff] %v719_v39 }
 0x3d4   :  { %759 = vst [vmem:[%s1273_s6 + $0x28] sm:$0xff] %v711_v41 }
 0x3d6   :  { %v994_v42 = vpop.f32.mrb[24].mxu1 }
 0x3d7   :  { %v732_v43 = vadd.f32 %v994_v42, %v807_v32  ;;  %v723_v44 = vpop.f32.mrb[25].mxu1 }
 0x3d8   :  { %v724_v45 = vadd.f32 %v807_v32, %v723_v44  ;;  %v995_v53 = vpop.f32.mrb[26].mxu1 }
 0x3d9   :  { %764 = vst [vmem:[%s1273_s6 + $0x50] sm:$0xff] %v732_v43  ;;  %v735_v54 = vadd.f32 %v995_v53, %v807_v32  ;;  %v726_v55 = vpop.f32.mrb[27].mxu1 }
 0x3da   :  { %762 = vst [vmem:[%s1273_s6 + $0x40] sm:$0xff] %v724_v45  ;;  %v727_v57 = vadd.f32 %v807_v32, %v726_v55 }
 0x3db   :  { %765 = vst [vmem:[%s1273_s6 + $0x58] sm:$0xff] %v735_v54 }
 0x3dc   :  { %763 = vst [vmem:[%s1273_s6 + $0x48] sm:$0xff] %v727_v57 }
 0x3de   :  { %v998_v58 = vpop.f32.mrb[28].mxu1 }
 0x3df   :  { %v748_v59 = vadd.f32 %v998_v58, %v807_v32  ;;  %v739_v60 = vpop.f32.mrb[29].mxu1 }
 0x3e0   :  { %v740_v61 = vadd.f32 %v807_v32, %v739_v60  ;;  %v999_v62 = vpop.f32.mrb[30].mxu1 }
 0x3e1   :  { %768 = vst [vmem:[%s1273_s6 + $0x70] sm:$0xff] %v748_v59  ;;  %v751_v63 = vadd.f32 %v999_v62, %v807_v32  ;;  %v742_v0 = vpop.f32.mrb[31].mxu1 }
 0x3e2   :  { %766 = vst [vmem:[%s1273_s6 + $0x60] sm:$0xff] %v740_v61  ;;  %v743_v1 = vadd.f32 %v807_v32, %v742_v0 }
 0x3e3   :  { %769 = vst [vmem:[%s1273_s6 + $0x78] sm:$0xff] %v751_v63 }
 0x3e4   :  { %767 = vst [vmem:[%s1273_s6 + $0x68] sm:$0xff] %v743_v1 }

</bundles_post_ra>
